<compile_context>
chip_gen: v7x
topology: tpu7x:2x2x1
jax: 0.10.0
libtpu: 0.0.40
codegen_flags: <defaults>
</compile_context>

<pallas_src>
import jax
import jax.numpy as jnp
from jax.experimental import pallas as pl
from jax.experimental.pallas import tpu as pltpu


def _film_fused_kernel(x_ref, w_ref, b_ref, out_ref):
    # Single MXU pass over the fused (In, 2*Out) weight, f32 accumulation,
    # f32 bias add, one lane-dense (TB, 2*Out) store.
    acc = jnp.dot(x_ref[...], w_ref[...], preferred_element_type=jnp.float32)
    out_ref[...] = (acc + b_ref[...].astype(jnp.float32)).astype(out_ref.dtype)


def fuse_film_params(w1, b1, w2, b2, dtype=None):
    """Fuse the two Linear layers' parameters. Call ONCE at parameter-load time
    (not per forward call): W -> (In, 2*Out), b -> (1, 2*Out)."""
    w = jnp.concatenate([w1, w2], axis=1)
    b = jnp.concatenate([b1, b2]).reshape(1, -1)
    if dtype is not None:
        w = w.astype(dtype)
        b = b.astype(dtype)
    return w, b


def film_layer_fused(x, w_fused, b_fused, *, block_b=512):
    """x: (B, In); w_fused: (In, 2*Out); b_fused: (1, 2*Out).
    Returns the fused (B, 2*Out) array [gamma | beta] (lane-dense output)."""
    B, In = x.shape
    N = w_fused.shape[1]
    itemsize = jnp.dtype(x.dtype).itemsize
    cost = pl.CostEstimate(
        flops=2 * B * In * N,
        transcendentals=0,
        bytes_accessed=(x.size + w_fused.size + b_fused.size) * itemsize
        + B * N * itemsize,
    )

    if B <= block_b:
        # Small-batch path: gridless, fully VMEM-resident, no pipeline machinery.
        return pl.pallas_call(
            _film_fused_kernel,
            out_shape=jax.ShapeDtypeStruct((B, N), x.dtype),
            in_specs=[
                pl.BlockSpec(memory_space=pltpu.MemorySpace.VMEM),  # x
                pl.BlockSpec(memory_space=pltpu.MemorySpace.VMEM),  # fused W
                pl.BlockSpec(memory_space=pltpu.MemorySpace.VMEM),  # fused bias
            ],
            out_specs=pl.BlockSpec(memory_space=pltpu.MemorySpace.VMEM),
            cost_estimate=cost,
        )(x, w_fused, b_fused)

    # Batched path: 1-D grid over B; W/bias stay resident across the grid.
    tb = min(block_b, B)
    grid = (pl.cdiv(B, tb),)
    return pl.pallas_call(
        _film_fused_kernel,
        out_shape=jax.ShapeDtypeStruct((B, N), x.dtype),
        grid=grid,
        in_specs=[
            pl.BlockSpec((tb, In), lambda i: (i, 0)),   # x tile (In == full extent)
            pl.BlockSpec((In, N), lambda i: (0, 0)),    # fused W, resident
            pl.BlockSpec((1, N), lambda i: (0, 0)),     # fused bias, resident
        ],
        out_specs=pl.BlockSpec((tb, N), lambda i: (i, 0)),  # lane-dense 128-wide store
        cost_estimate=cost,
        compiler_params=pltpu.CompilerParams(
            dimension_semantics=("parallel",),          # v7x: shard B across both TCs
        ),
    )(x, w_fused, b_fused)


def film_layer(x, w_fused, b_fused, *, block_b=512):
    """Module-API wrapper: returns (gamma, beta), each (B, Out).

    Prefer consuming film_layer_fused()'s output directly in the downstream
    FiLM-apply kernel so the split fuses instead of materializing two slices.
    """
    fused = film_layer_fused(x, w_fused, b_fused, block_b=block_b)
    out = fused.shape[1] // 2
    # TODO(synk): fold this split (and ideally the whole x@W+b) into the kernel
    # that consumes gamma/beta; at tiny B the matmul cannot amortize a launch.
    return fused[:, :out], fused[:, out:]


if __name__ == "__main__":
    # Module config + small input shapes implied by the forward pass.
    batch = 8
    input_size = 32
    output_size = 64

    key = jax.random.PRNGKey(0)
    kx, kw1, kb1, kw2, kb2, kxb = jax.random.split(key, 6)

    x = jax.random.normal(kx, (batch, input_size), dtype=jnp.float32)

    # Deterministic init (PyTorch Linear weight is (out, in); stored transposed
    # as (in, out) so the kernel computes x @ W directly).
    bound = 1.0 / (input_size ** 0.5)
    w1 = jax.random.uniform(kw1, (input_size, output_size), jnp.float32, -bound, bound)
    b1 = jax.random.uniform(kb1, (output_size,), jnp.float32, -bound, bound)
    w2 = jax.random.uniform(kw2, (input_size, output_size), jnp.float32, -bound, bound)
    b2 = jax.random.uniform(kb2, (output_size,), jnp.float32, -bound, bound)

    # Fuse ONCE at load time (not on the per-call path).
    w_fused, b_fused = fuse_film_params(w1, b1, w2, b2)

    # Small-batch (gridless) path — matches the module's forward().
    gamma, beta = film_layer(x, w_fused, b_fused)
    jax.block_until_ready((gamma, beta))

    gamma_ref = x @ w1 + b1
    beta_ref = x @ w2 + b2
    assert jnp.allclose(gamma, gamma_ref, atol=1e-5), "gamma mismatch"
    assert jnp.allclose(beta, beta_ref, atol=1e-5), "beta mismatch"

    # Batched (tiled-grid) path — many FiLM rows per call.
    big_batch = 1024
    xb = jax.random.normal(kxb, (big_batch, input_size), dtype=jnp.float32)
    fused_b = film_layer_fused(xb, w_fused, b_fused, block_b=512)
    jax.block_until_ready(fused_b)

    fused_ref = jnp.concatenate([xb @ w1 + b1, xb @ w2 + b2], axis=1)
    assert jnp.allclose(fused_b, fused_ref, atol=1e-5), "batched fused mismatch"

    print("KERNEL_OK")
</pallas_src>

<mosaic_0001>
module attributes {stable_mosaic.version = 11 : i64} {
  func.func @_film_fused_kernel(%arg0: memref<8x32xf32, #tpu.memory_space<vmem>>, %arg1: memref<32x128xf32, #tpu.memory_space<vmem>>, %arg2: memref<1x128xf32, #tpu.memory_space<vmem>>, %arg3: memref<8x128xf32, #tpu.memory_space<vmem>>) attributes {dimension_semantics = [], scalar_prefetch = 0 : i64, scratch_operands = 0 : i64, tpu.core_type = #tpu.core_type<tc>} {
    %c0 = arith.constant 0 : index
    %c0_0 = arith.constant 0 : index
    %0 = vector.load %arg0[%c0, %c0_0] : memref<8x32xf32, #tpu.memory_space<vmem>>, vector<8x32xf32>
    %c0_1 = arith.constant 0 : index
    %c0_2 = arith.constant 0 : index
    %1 = vector.load %arg1[%c0_1, %c0_2] : memref<32x128xf32, #tpu.memory_space<vmem>>, vector<32x128xf32>
    %cst = arith.constant dense<0.000000e+00> : vector<8x128xf32>
    %2 = tpu.matmul %0, %1, %cst {dimension_numbers = #tpu.dot_dimension_numbers<[1], [0], [0], [1], [0, 0, 1, 1], [], []>} : vector<8x32xf32>, vector<32x128xf32>, vector<8x128xf32> -> vector<8x128xf32>
    %c0_3 = arith.constant 0 : index
    %c0_4 = arith.constant 0 : index
    %3 = vector.load %arg2[%c0_3, %c0_4] : memref<1x128xf32, #tpu.memory_space<vmem>>, vector<1x128xf32>
    %4 = vector.broadcast %3 : vector<1x128xf32> to vector<8x128xf32>
    %5 = arith.addf %2, %4 : vector<8x128xf32>
    %c0_5 = arith.constant 0 : index
    %c0_6 = arith.constant 0 : index
    %6 = vector.load %arg3[%c0_5, %c0_6] : memref<8x128xf32, #tpu.memory_space<vmem>>, vector<8x128xf32>
    tpu.vector_store %arg3[%c0_5, %c0_6], %5 {strides = array<i32>} : memref<8x128xf32, #tpu.memory_space<vmem>>, vector<8x128xf32>,
    return
  }
}

</mosaic_0001>

<bundles_post_ra>
// kernel: tpu_custom_call.1
= control target key start
LH: loop header
LB: loop body
LE: loop exit
PB: predicated region body
PF: predicated region fallthrough
CT: control target
= control target key end

     0   :  { %8 = vsyncpa [#allocation3], 0  ;;  %s322_s0 = inlined_call_operand.hbm [shape: f32[8,32], index: 0, kind: input, shape index: {}]   ;;  %s323_s1 = inlined_call_operand.hbm [shape: f32[32,128], index: 1, kind: input, shape index: {}]   ;;  %s324_s2 = inlined_call_operand.vmem [shape: f32[1,128], index: 2, kind: input, shape index: {}]   ;;  %s325_s3 = inlined_call_operand.hbm [shape: f32[8,128], index: 3, kind: output, shape index: {}]  }
   0x1   :  { %9 = vsyncpa [#allocation6], 0 }
   0x2   :  { %10 = vsyncpa [#allocation4], 0  ;;  %s248_s12 = smov [#allocation2]   ;;  %s249_s14 = smov [#allocation5]  }
   0x3   :  { %s17_s13 = sshll.u32 %s248_s12, 4  ;;  %s26_s15 = sshll.u32 %s249_s14, 4  ;;  %s18_s13 = int_to_ptr.vmem [resolvable:$true] %s17_s13  ;;  %s276_s15 = int_to_ptr.vmem [resolvable:$true] %s26_s15 }
   0x4   :  { %s176_s18 = scalar_lea.hbm %s322_s0, 128 }
   0x5   :  { %p177_p0 = scmp.ne.s32.totalorder %s322_s0, %s176_s18  ;;  %p180_p1 = scmp.lt.u32.totalorder %s176_s18, %s322_s0 }
   0x7   :  { %p182_p2 = pnand %p180_p1, %p177_p0 }
   0x9   :  { %185 = shalt.err (!%p182_p2)
}
   0xa   :  { %s186_s23 = scalar_lea.vmem %s18_s13, 128  ;;  %p191_p4 = scmp.lt.s32.totalorder %s18_s13, %s18_s13 }
   0xb   :  { %p187_p3 = scmp.ne.s32.totalorder %s18_s13, %s186_s23  ;;  %p192_p5 = scmp.lt.s32.totalorder %s186_s23, %s186_s23 }
   0xd   :  { %p193_p6 = por %p192_p5, %p191_p4 }
   0xf   :  { %p194_p7 = pnand %p193_p6, %p187_p3 }
  0x11   :  { %197 = shalt.err (!%p194_p7)
}
  0x12   :  { %20 = dma.hbm_to_vmem [thread:$0]  %s322_s0, 128, %s18_s13, [#allocation3]  }
  0x13   :  { %s198_s28 = scalar_lea.hbm %s323_s1, 512 }
  0x14   :  { %p199_p8 = scmp.ne.s32.totalorder %s323_s1, %s198_s28  ;;  %p202_p9 = scmp.lt.u32.totalorder %s198_s28, %s323_s1 }
  0x16   :  { %p204_p10 = pnand %p202_p9, %p199_p8 }
  0x18   :  { %207 = shalt.err (!%p204_p10)
}
  0x19   :  { %s208_s6 = scalar_lea.vmem %s276_s15, 512  ;;  %p213_p12 = scmp.lt.s32.totalorder %s276_s15, %s276_s15 }
  0x1a   :  { %p209_p11 = scmp.ne.s32.totalorder %s276_s15, %s208_s6  ;;  %p214_p13 = scmp.lt.s32.totalorder %s208_s6, %s208_s6 }
  0x1c   :  { %p215_p0 = por %p214_p13, %p213_p12 }
  0x1e   :  { %p216_p1 = pnand %p215_p0, %p209_p11 }
  0x20   :  { %219 = shalt.err (!%p216_p1)
}
  0x21   :  { %s250_s0 = smov 128   ;;  %s251_s7 = smov 8  }
  0x22   :  { %32 = dma.hbm_to_vmem [thread:$0]  %s323_s1, 512, %s276_s15, [#allocation6], %s250_s0, %s250_s0, %s251_s7  }
  0x23   :  { %242 = dma.done.wait [#allocation3], 128  }
  0x24   :  { %243 = vsyncadd [#allocation3], 4294967168 }
  0x25   :  { %244 = dma.done.wait [#allocation6], 512  }
  0x26   :  { %245 = vsyncadd [#allocation6], 4294966784  ;;  %v252_v0 = vmov 0.0|0.0   ;;  %vm253_vm0 = vmmov 0   ;;  %v254_v1 = vmov 0.0   ;;  %v42_v2 = vld [vmem:[#allocation5] sm:$0xff] }
  0x27   :  { %162 = vmatprep.subr.bf16.mxu0 %v252_v0  ;;  %159 = vmatprep.mubr.msk.f32.mxu0 %vm253_vm0, %v254_v1  ;;  %v43_v3 = vld [vmem:[#allocation5 + $0x8] sm:$0xff]  ;;  %v44_v4 = vld [vmem:[#allocation5 + $0x10] sm:$0xff]  ;;  %v45_v6 = vld [vmem:[#allocation5 + $0x18] sm:$0xff]  ;;  %vm53_vm1 = vcmask 261120   ;;  %s255_s11 = smov [#allocation7]  }
  0x28   :  { %v163_v5 = vpack.c.bf16 %v43_v3, %v42_v2  ;;  %v166_v7 = vpack.c.bf16 %v45_v6, %v44_v4  ;;  %v41_v8 = vld [vmem:[#allocation2] sm:$0xff]  ;;  %s134_s12 = sshll.u32 %s255_s11, 4  ;;  %s135_s12 = int_to_ptr.vmem [resolvable:$true] %s134_s12 }
  0x29   :  { %v144_v9 = vld [vmem:[%s324_s2] ss:$0 sm:$0xff]  ;;  %s220_s13 = scalar_lea.vmem %s135_s12, 128  ;;  %p225_p3 = scmp.lt.s32.totalorder %s135_s12, %s135_s12 }
  0x2a   :  { %164 = vmatpush3.bf16.msra.mxu0 %v163_v5  ;;  %p221_p2 = scmp.ne.s32.totalorder %s135_s12, %s220_s13  ;;  %p226_p4 = scmp.lt.s32.totalorder %s220_s13, %s220_s13 }
  0x2b   :  { %165 = vmatprep.subr.bf16.mxu0 %v252_v0 }
  0x2c   :  { %p227_p5 = por %p226_p4, %p225_p3 }
  0x2e   :  { %167 = vmatpush3.bf16.msra.mxu0 %v166_v7  ;;  %p228_p6 = pnand %p227_p5, %p221_p2 }
  0x31   :  { %160 = vmatmul.mubr.msk.f32.vlgmr.msra.gmra.mrb[0].mxu0 %vm53_vm1, %v41_v8 }
 0x104   :  { %v123_v10 = vpop.f32.mrb[0].mxu0 }
 0x105   :  { %v124_v11 = vadd.f32 %v144_v9, %v123_v10  ;;  %v161_v12 = vpop.f32.mrb[1].mxu0 }
 0x107   :  { %127 = vst [vmem:[#allocation7] sm:$0xff] %v124_v11 }
 0x108   :  { %231 = shalt.err (!%p228_p6)
}
 0x109   :  { %s232_s16 = scalar_lea.hbm %s325_s3, 128 }
 0x10a   :  { %p233_p7 = scmp.ne.s32.totalorder %s325_s3, %s232_s16  ;;  %p236_p8 = scmp.lt.u32.totalorder %s232_s16, %s325_s3 }
 0x10c   :  { %p238_p9 = pnand %p236_p8, %p233_p7 }
 0x10e   :  { %241 = shalt.err (!%p238_p9)
}
 0x10f   :  { %137 = dma.vmem_to_hbm [thread:$0]  %s135_s12, 128, %s325_s3, [#allocation4]  }
 0x110   :  { %246 = dma.done.wait [#allocation4], 128  }
 0x111   :  { %247 = vsyncadd [#allocation4], 4294967168 }
 0x112   :  { %141 = vsyncpa [#allocation3], 1 }
 0x113   :  { %142 = vsyncpa [#allocation6], 1 }
 0x114   :  { %143 = vsyncpa [#allocation4], 1 }

</bundles_post_ra>
